<compile_context>
chip_gen: v7x
topology: tpu7x:2x2x1
jax: 0.10.0
libtpu: 0.0.40
codegen_flags: <defaults>
</compile_context>

<pallas_src>
import jax
import jax.numpy as jnp
import numpy as np
from jax.experimental import pallas as pl
from jax.experimental.pallas import tpu as pltpu

# ---- hyperparameters (stand-ins for argparse `opt`) ----
N_CLASSES = 10
CHANNELS = 1
IMG_SIZE = 16
HIDDEN = 512
IMG_SHAPE = (CHANNELS, IMG_SIZE, IMG_SIZE)
D_IN = N_CLASSES + int(np.prod(IMG_SHAPE))      # 10 + 256 = 266

LANE = 128
BF16_SUBLANE = 16                               # bf16 packs 16 rows per vreg sublane group


def _pad_to(n, m):
    return ((n + m - 1) // m) * m


D_IN_PAD = _pad_to(D_IN, LANE)                  # 384


def _mlp_kernel(x_ref, w1_ref, b1_ref, w2_ref, b2_ref, w3_ref, b3_ref, o_ref):
    """Fused 3-layer MLP on one batch tile.

    x: (TB, D_IN_PAD) bf16; w1/w2: bf16; w3: (1, HIDDEN) f32 row; biases f32.
    Matmuls accumulate in f32 on the MXU; LeakyReLU stays in f32 (v5e-safe).
    Output is a packed, lane-dense (1, TB) row.
    """
    x = x_ref[...]                                                        # (TB, D_IN_PAD) bf16
    h1 = jnp.dot(x, w1_ref[...], preferred_element_type=jnp.float32) + b1_ref[...]
    h1 = jnp.where(h1 > 0, h1, 0.2 * h1)                                  # LeakyReLU(0.2), f32
    h2 = jnp.dot(h1.astype(jnp.bfloat16), w2_ref[...],
                 preferred_element_type=jnp.float32) + b2_ref[...]
    # Dropout(0.4): eval-mode identity.
    # TODO(synk): train-mode stochastic dropout (pltpu.prng_*) not implemented.
    h2 = jnp.where(h2 > 0, h2, 0.2 * h2)                                  # LeakyReLU(0.2), f32
    # Layer 3 (512 -> 1): contract w3 (1,H) against h2 (TB,H) on their last dims
    # -> (1, TB) packed lane-dense row (no zero-padded 512x128 matmul, no (TB,128)
    # broadcast store).
    out_row = jax.lax.dot_general(
        w3_ref[...], h2,
        dimension_numbers=(((1,), (1,)), ((), ())),
        preferred_element_type=jnp.float32)                               # (1, TB)
    o_ref[...] = out_row + b3_ref[...]


def init_params(key):
    """Parameter init mirroring PyTorch defaults; weights stored pre-padded & bf16."""
    ks = jax.random.split(key, 7)

    def lin(kw, kb, fan_in, fan_out):
        bound = 1.0 / np.sqrt(fan_in)
        w = jax.random.uniform(kw, (fan_in, fan_out), jnp.float32, -bound, bound)
        b = jax.random.uniform(kb, (1, fan_out), jnp.float32, -bound, bound)
        return w, b

    emb = jax.random.normal(ks[0], (N_CLASSES, N_CLASSES), jnp.float32)   # nn.Embedding ~ N(0,1)
    w1, b1 = lin(ks[1], ks[2], D_IN, HIDDEN)
    w2, b2 = lin(ks[3], ks[4], HIDDEN, HIDDEN)
    w3, b3 = lin(ks[5], ks[6], HIDDEN, 1)

    # Hoisted, one-time padding + bf16 cast (kernel-ready layout).
    w1_pad = jnp.zeros((D_IN_PAD, HIDDEN), jnp.float32).at[:D_IN, :].set(w1)
    return dict(
        emb=emb,
        w1=w1_pad.astype(jnp.bfloat16),            # (D_IN_PAD, HIDDEN) bf16
        b1=b1,                                     # (1, HIDDEN) f32
        w2=w2.astype(jnp.bfloat16),                # (HIDDEN, HIDDEN) bf16
        b2=b2,                                     # (1, HIDDEN) f32
        w3_row=w3.T,                               # (1, HIDDEN) f32 (tiny; keep full precision)
        b3=b3.reshape(1, 1),                       # (1, 1) f32
    )


def _tile_plan(B, tile_b):
    """Pick (TB, B_pad).

    Small batches (< 512 after padding) run as a single full-dim block (no
    (8,128)/(16,128) constraint, minimal row-pad waste).  Large batches use a
    lane-aligned tile, rounded to a multiple of 256, and are capped so the
    'parallel' batch axis has >= 2 grid steps (v7x megacore sharding).
    """
    B16 = _pad_to(max(B, BF16_SUBLANE), BF16_SUBLANE)
    if B16 < 512:
        return B16, B16
    tb = min(tile_b, B16)
    tb = max(256, (tb // 256) * 256)
    tb = min(tb, max(256, ((B16 // 2) // 256) * 256))   # guarantee >= 2 grid steps
    return tb, _pad_to(B16, tb)


def d_forward(params, img, labels, *, tile_b=1024):
    """img: (B, C, H, W) float32 (NCHW); labels: (B,) int32. Returns (B, 1) float32."""
    B = img.shape[0]
    img_flat = img.reshape(B, -1)                                         # (B, C*H*W)
    lbl_emb = jnp.take(params["emb"], labels, axis=0)                     # (B, n_classes) glue gather
    # Lane-padded kernel input built directly in bf16 (halves the streamed bytes,
    # no f32 concat round trip).
    x = jnp.concatenate(
        [img_flat.astype(jnp.bfloat16),
         lbl_emb.astype(jnp.bfloat16),
         jnp.zeros((B, D_IN_PAD - D_IN), jnp.bfloat16)], axis=-1)          # (B, D_IN_PAD) bf16

    TB, B_pad = _tile_plan(B, tile_b)
    if B_pad != B:
        x = jnp.concatenate([x, jnp.zeros((B_pad - B, D_IN_PAD), jnp.bfloat16)], axis=0)

    grid = (B_pad // TB,)
    out_row = pl.pallas_call(
        _mlp_kernel,
        out_shape=jax.ShapeDtypeStruct((1, B_pad), jnp.float32),           # packed output row
        grid=grid,
        in_specs=[
            pl.BlockSpec((TB, D_IN_PAD), lambda i: (i, 0)),               # x: tiled on batch
            pl.BlockSpec((D_IN_PAD, HIDDEN), lambda i: (0, 0)),           # weights stay VMEM-resident
            pl.BlockSpec((1, HIDDEN), lambda i: (0, 0)),
            pl.BlockSpec((HIDDEN, HIDDEN), lambda i: (0, 0)),
            pl.BlockSpec((1, HIDDEN), lambda i: (0, 0)),
            pl.BlockSpec((1, HIDDEN), lambda i: (0, 0)),                  # w3 row (f32)
            pl.BlockSpec((1, 1), lambda i: (0, 0)),                       # b3 scalar
        ],
        out_specs=pl.BlockSpec((1, TB), lambda i: (0, i)),                # lane-dense packed tile
        compiler_params=pltpu.CompilerParams(
            dimension_semantics=("parallel",),                            # megacore on v7x
            vmem_limit_bytes=32 * 1024 * 1024,                            # explicit budget (v7x-safe)
        ),
    )(x, params["w1"], params["b1"], params["w2"], params["b2"],
      params["w3_row"], params["b3"])

    return out_row[0, :B].reshape(B, 1)                                   # back to (B, 1)


def _reference(params, img, labels):
    """Pure-JAX reference: same bf16-quantized inputs/weights, f32 math."""
    B = img.shape[0]
    img_flat = img.reshape(B, -1).astype(jnp.bfloat16).astype(jnp.float32)
    lbl = jnp.take(params["emb"], labels, axis=0).astype(jnp.bfloat16).astype(jnp.float32)
    x = jnp.concatenate([img_flat, lbl], -1)
    lrelu = lambda v: jnp.where(v > 0, v, 0.2 * v)
    w1 = params["w1"].astype(jnp.float32)[:D_IN, :]
    w2 = params["w2"].astype(jnp.float32)
    h = lrelu(x @ w1 + params["b1"])
    h = lrelu(h @ w2 + params["b2"])
    return h @ params["w3_row"].T + params["b3"]                          # (B, 1)


if __name__ == "__main__":
    key = jax.random.PRNGKey(0)
    k_param, k_img, k_lbl = jax.random.split(key, 3)

    params = init_params(k_param)
    B = 8
    img = jax.random.normal(k_img, (B, CHANNELS, IMG_SIZE, IMG_SIZE), jnp.float32)
    labels = jax.random.randint(k_lbl, (B,), 0, N_CLASSES, jnp.int32)

    d_fwd = jax.jit(d_forward)
    out = d_fwd(params, img, labels)
    out = jax.block_until_ready(out)

    ref = _reference(params, img, labels)
    assert out.shape == (B, 1), out.shape
    # bf16 inputs/weights/activations inside the kernel -> loosened tolerance.
    np.testing.assert_allclose(np.asarray(out), np.asarray(ref), rtol=2e-2, atol=2e-2)
    print("KERNEL_OK")
</pallas_src>

<mosaic_0001>
module attributes {stable_mosaic.version = 11 : i64} {
  func.func @_mlp_kernel(%arg0: i32, %arg1: memref<16x384xbf16, #tpu.memory_space<vmem>>, %arg2: memref<384x512xbf16, #tpu.memory_space<vmem>>, %arg3: memref<1x512xf32, #tpu.memory_space<vmem>>, %arg4: memref<512x512xbf16, #tpu.memory_space<vmem>>, %arg5: memref<1x512xf32, #tpu.memory_space<vmem>>, %arg6: memref<1x512xf32, #tpu.memory_space<vmem>>, %arg7: memref<1x1xf32, #tpu.memory_space<vmem>>, %arg8: memref<1x16xf32, #tpu.memory_space<vmem>>) attributes {dimension_semantics = [#tpu.dimension_semantics<parallel>], iteration_bounds = array<i64: 1>, scalar_prefetch = 0 : i64, scratch_operands = 0 : i64, tpu.core_type = #tpu.core_type<tc>, window_params = [{transform_indices = @transform_0, window_bounds = array<i64: 16, 384>}, {pipeline_mode = #tpu.pipeline_mode<synchronous>, transform_indices = @transform_1, window_bounds = array<i64: 384, 512>}, {pipeline_mode = #tpu.pipeline_mode<synchronous>, transform_indices = @transform_2, window_bounds = array<i64: 1, 512>}, {pipeline_mode = #tpu.pipeline_mode<synchronous>, transform_indices = @transform_3, window_bounds = array<i64: 512, 512>}, {pipeline_mode = #tpu.pipeline_mode<synchronous>, transform_indices = @transform_4, window_bounds = array<i64: 1, 512>}, {pipeline_mode = #tpu.pipeline_mode<synchronous>, transform_indices = @transform_5, window_bounds = array<i64: 1, 512>}, {pipeline_mode = #tpu.pipeline_mode<synchronous>, transform_indices = @transform_6, window_bounds = array<i64: 1, 1>}, {transform_indices = @transform_7, window_bounds = array<i64: 1, 16>}]} {
    %c0 = arith.constant 0 : index
    %c0_0 = arith.constant 0 : index
    %0 = vector.load %arg1[%c0, %c0_0] : memref<16x384xbf16, #tpu.memory_space<vmem>>, vector<16x384xbf16>
    %c0_1 = arith.constant 0 : index
    %c0_2 = arith.constant 0 : index
    %1 = vector.load %arg2[%c0_1, %c0_2] : memref<384x512xbf16, #tpu.memory_space<vmem>>, vector<384x512xbf16>
    %cst = arith.constant dense<0.000000e+00> : vector<16x512xf32>
    %2 = tpu.matmul %0, %1, %cst {dimension_numbers = #tpu.dot_dimension_numbers<[1], [0], [0], [1], [0, 0, 1, 1], [], []>} : vector<16x384xbf16>, vector<384x512xbf16>, vector<16x512xf32> -> vector<16x512xf32>
    %c0_3 = arith.constant 0 : index
    %c0_4 = arith.constant 0 : index
    %3 = vector.load %arg3[%c0_3, %c0_4] : memref<1x512xf32, #tpu.memory_space<vmem>>, vector<1x512xf32>
    %4 = vector.broadcast %3 : vector<1x512xf32> to vector<16x512xf32>
    %5 = arith.addf %2, %4 : vector<16x512xf32>
    %cst_5 = arith.constant 0.000000e+00 : f32
    %6 = vector.broadcast %cst_5 : f32 to vector<16x512xf32>
    %7 = arith.cmpf ogt, %5, %6 : vector<16x512xf32>
    %cst_6 = arith.constant 2.000000e-01 : f32
    %8 = vector.broadcast %cst_6 : f32 to vector<16x512xf32>
    %9 = arith.mulf %8, %5 : vector<16x512xf32>
    %10 = arith.select %7, %5, %9 : vector<16x512xi1>, vector<16x512xf32>
    %11 = arith.truncf %10 : vector<16x512xf32> to vector<16x512xbf16>
    %c0_7 = arith.constant 0 : index
    %c0_8 = arith.constant 0 : index
    %12 = vector.load %arg4[%c0_7, %c0_8] : memref<512x512xbf16, #tpu.memory_space<vmem>>, vector<512x512xbf16>
    %cst_9 = arith.constant dense<0.000000e+00> : vector<16x512xf32>
    %13 = tpu.matmul %11, %12, %cst_9 {dimension_numbers = #tpu.dot_dimension_numbers<[1], [0], [0], [1], [0, 0, 1, 1], [], []>} : vector<16x512xbf16>, vector<512x512xbf16>, vector<16x512xf32> -> vector<16x512xf32>
    %c0_10 = arith.constant 0 : index
    %c0_11 = arith.constant 0 : index
    %14 = vector.load %arg5[%c0_10, %c0_11] : memref<1x512xf32, #tpu.memory_space<vmem>>, vector<1x512xf32>
    %15 = vector.broadcast %14 : vector<1x512xf32> to vector<16x512xf32>
    %16 = arith.addf %13, %15 : vector<16x512xf32>
    %cst_12 = arith.constant 0.000000e+00 : f32
    %17 = vector.broadcast %cst_12 : f32 to vector<16x512xf32>
    %18 = arith.cmpf ogt, %16, %17 : vector<16x512xf32>
    %cst_13 = arith.constant 2.000000e-01 : f32
    %19 = vector.broadcast %cst_13 : f32 to vector<16x512xf32>
    %20 = arith.mulf %19, %16 : vector<16x512xf32>
    %21 = arith.select %18, %16, %20 : vector<16x512xi1>, vector<16x512xf32>
    %c0_14 = arith.constant 0 : index
    %c0_15 = arith.constant 0 : index
    %22 = vector.load %arg6[%c0_14, %c0_15] : memref<1x512xf32, #tpu.memory_space<vmem>>, vector<1x512xf32>
    %cst_16 = arith.constant dense<0.000000e+00> : vector<1x16xf32>
    %23 = tpu.matmul %22, %21, %cst_16 {dimension_numbers = #tpu.dot_dimension_numbers<[1], [1], [0], [0], [0, 0, 1, 0], [], []>} : vector<1x512xf32>, vector<16x512xf32>, vector<1x16xf32> -> vector<1x16xf32>
    %c0_17 = arith.constant 0 : index
    %c0_18 = arith.constant 0 : index
    %24 = vector.load %arg7[%c0_17, %c0_18] : memref<1x1xf32, #tpu.memory_space<vmem>>, vector<1x1xf32>
    %25 = vector.broadcast %24 : vector<1x1xf32> to vector<1x16xf32>
    %26 = arith.addf %23, %25 : vector<1x16xf32>
    %c0_19 = arith.constant 0 : index
    %c0_20 = arith.constant 0 : index
    %27 = vector.load %arg8[%c0_19, %c0_20] : memref<1x16xf32, #tpu.memory_space<vmem>>, vector<1x16xf32>
    tpu.vector_store %arg8[%c0_19, %c0_20], %26 {strides = array<i32>} : memref<1x16xf32, #tpu.memory_space<vmem>>, vector<1x16xf32>,
    return
  }
  func.func @transform_0(%arg0: i32) -> (i32, i32) {
    %c0_i32 = arith.constant 0 : i32
    %c0_i32_0 = arith.constant 0 : i32
    return %arg0, %c0_i32 : i32, i32
  }
  func.func @transform_1(%arg0: i32) -> (i32, i32) {
    %c0_i32 = arith.constant 0 : i32
    %c0_i32_0 = arith.constant 0 : i32
    %c0_i32_1 = arith.constant 0 : i32
    return %c0_i32, %c0_i32_0 : i32, i32
  }
  func.func @transform_2(%arg0: i32) -> (i32, i32) {
    %c0_i32 = arith.constant 0 : i32
    %c0_i32_0 = arith.constant 0 : i32
    %c0_i32_1 = arith.constant 0 : i32
    return %c0_i32, %c0_i32_0 : i32, i32
  }
  func.func @transform_3(%arg0: i32) -> (i32, i32) {
    %c0_i32 = arith.constant 0 : i32
    %c0_i32_0 = arith.constant 0 : i32
    %c0_i32_1 = arith.constant 0 : i32
    return %c0_i32, %c0_i32_0 : i32, i32
  }
  func.func @transform_4(%arg0: i32) -> (i32, i32) {
    %c0_i32 = arith.constant 0 : i32
    %c0_i32_0 = arith.constant 0 : i32
    %c0_i32_1 = arith.constant 0 : i32
    return %c0_i32, %c0_i32_0 : i32, i32
  }
  func.func @transform_5(%arg0: i32) -> (i32, i32) {
    %c0_i32 = arith.constant 0 : i32
    %c0_i32_0 = arith.constant 0 : i32
    %c0_i32_1 = arith.constant 0 : i32
    return %c0_i32, %c0_i32_0 : i32, i32
  }
  func.func @transform_6(%arg0: i32) -> (i32, i32) {
    %c0_i32 = arith.constant 0 : i32
    %c0_i32_0 = arith.constant 0 : i32
    %c0_i32_1 = arith.constant 0 : i32
    return %c0_i32, %c0_i32_0 : i32, i32
  }
  func.func @transform_7(%arg0: i32) -> (i32, i32) {
    %c0_i32 = arith.constant 0 : i32
    %c0_i32_0 = arith.constant 0 : i32
    return %c0_i32, %arg0 : i32, i32
  }
}

</mosaic_0001>

<bundles_post_ra>
// kernel: d_forward.1
= control target key start
LH: loop header
LB: loop body
LE: loop exit
PB: predicated region body
PF: predicated region fallthrough
CT: control target
= control target key end

     0   :  { %s2833_s0 = inlined_call_operand.vmem [shape: bf16[16,384], index: 0, kind: input, shape index: {}]   ;;  %s2834_s1 = inlined_call_operand.hbm [shape: bf16[384,512], index: 1, kind: input, shape index: {}]   ;;  %s2835_s2 = inlined_call_operand.vmem [shape: f32[1,512], index: 2, kind: input, shape index: {}]   ;;  %s2836_s3 = inlined_call_operand.hbm [shape: bf16[512,512], index: 3, kind: input, shape index: {}]   ;;  %s2837_s4 = inlined_call_operand.vmem [shape: f32[1,512], index: 4, kind: input, shape index: {}]   ;;  %s2838_s5 = inlined_call_operand.vmem [shape: f32[1,512], index: 5, kind: input, shape index: {}]   ;;  %s2839_s6 = inlined_call_operand.<no memory space> [shape: f32[1,1], index: 6, kind: input, shape index: {}]   ;;  %s2840_s7 = inlined_call_operand.vmem [shape: f32[1,16], index: 7, kind: output, shape index: {}]  }
   0x1   :  { %v12_v0 = vstv %s2839_s6 }
   0x2   :  { %13 = vst [vmem:[#allocation2] sm:$0x1] %v12_v0 }
   0x3   :  { %14 = vsyncpa [#allocation4], 0 }
   0x4   :  { %15 = vsyncpa [#allocation6], 0  ;;  %s2704_s26 = smov [#allocation3]   ;;  %s2656_s30 = scalar_lea.hbm %s2834_s1, 12288 }
   0x5   :  { %s23_s27 = sshll.u32 %s2704_s26, 4  ;;  %p2657_p0 = scmp.ne.s32.totalorder %s2834_s1, %s2656_s30  ;;  %s24_s27 = int_to_ptr.vmem [resolvable:$true] %s23_s27 }
   0x6   :  { %p2660_p1 = scmp.lt.u32.totalorder %s2656_s30, %s2834_s1 }
   0x8   :  { %p2662_p2 = pnand %p2660_p1, %p2657_p0 }
   0xa   :  { %2665 = shalt.err (!%p2662_p2)
}
   0xb   :  { %s2666_s6 = scalar_lea.vmem %s24_s27, 12288  ;;  %p2671_p4 = scmp.lt.s32.totalorder %s24_s27, %s24_s27 }
   0xc   :  { %p2667_p3 = scmp.ne.s32.totalorder %s24_s27, %s2666_s6  ;;  %p2672_p5 = scmp.lt.s32.totalorder %s2666_s6, %s2666_s6 }
   0xe   :  { %p2673_p6 = por %p2672_p5, %p2671_p4 }
  0x10   :  { %p2674_p7 = pnand %p2673_p6, %p2667_p3 }
  0x12   :  { %2677 = shalt.err (!%p2674_p7)
}
  0x13   :  { %s2705_s12 = smov 256   ;;  %s2706_s13 = smov 16  }
  0x14   :  { %29 = dma.hbm_to_vmem [thread:$0]  %s2834_s1, 12288, %s24_s27, [#allocation4], %s2705_s12, %s2705_s12, %s2706_s13  }
  0x15   :  { %s2707_s16 = smov [#allocation5]   ;;  %s2678_s20 = scalar_lea.hbm %s2836_s3, 16384 }
  0x16   :  { %s37_s17 = sshll.u32 %s2707_s16, 4  ;;  %p2679_p8 = scmp.ne.s32.totalorder %s2836_s3, %s2678_s20  ;;  %s38_s17 = int_to_ptr.vmem [resolvable:$true] %s37_s17 }
  0x17   :  { %p2682_p9 = scmp.lt.u32.totalorder %s2678_s20, %s2836_s3 }
  0x19   :  { %p2684_p10 = pnand %p2682_p9, %p2679_p8 }
  0x1b   :  { %2687 = shalt.err (!%p2684_p10)
}
  0x1c   :  { %s2688_s25 = scalar_lea.vmem %s38_s17, 16384  ;;  %p2693_p12 = scmp.lt.s32.totalorder %s38_s17, %s38_s17 }
  0x1d   :  { %p2689_p11 = scmp.ne.s32.totalorder %s38_s17, %s2688_s25  ;;  %p2694_p13 = scmp.lt.s32.totalorder %s2688_s25, %s2688_s25 }
  0x1f   :  { %p2695_p0 = por %p2694_p13, %p2693_p12 }
  0x21   :  { %p2696_p1 = pnand %p2695_p0, %p2689_p11 }
  0x23   :  { %2699 = shalt.err (!%p2696_p1)
}
  0x24   :  { %43 = dma.hbm_to_vmem [thread:$0]  %s2836_s3, 16384, %s38_s17, [#allocation6], %s2705_s12, %s2705_s12, %s2706_s13  }
  0x25   :  { %2700 = dma.done.wait [#allocation4], 12288  }
  0x26   :  { %2701 = vsyncadd [#allocation4], 4294955008 }
  0x27   :  { %2702 = dma.done.wait [#allocation6], 16384  }
  0x28   :  { %2703 = vsyncadd [#allocation6], 4294950912  ;;  %v2708_v1 = vmov 0   ;;  %v2316_v2 = vld [vmem:[#allocation3 + $0x4] ss:$16 sps:$4 sm:$0xff]  }
  0x29   :  { %2315 = vset.pattern.permute.xlu0 %v2708_v1  ;;  %v2318_v3 = vld [vmem:[#allocation3] ss:$16 sps:$4 sm:$0xff]   ;;  %675 = vmatprep.subr.bf16.mxu0 %v2316_v2  ;;  %v2319_v4 = vld [vmem:[#allocation3 + $0x24] ss:$16 sps:$4 sm:$0xff]   ;;  %v2337_v9 = vld [vmem:[#allocation3 + $0xc] ss:$16 sps:$4 sm:$0xff]  }
  0x2a   :  { %676 = vmatpush1.bf16.msra.mxu0 %v2318_v3  ;;  %v2321_v5 = vld [vmem:[#allocation3 + $0x20] ss:$16 sps:$4 sm:$0xff]   ;;  %v2322_v6 = vld [vmem:[#allocation3 + $0x44] ss:$16 sps:$4 sm:$0xff]   ;;  %v2341_v12 = vld [vmem:[#allocation3 + $0x8] ss:$16 sps:$4 sm:$0xff]   ;;  %761 = vmatprep.subr.bf16.mxu1 %v2337_v9 }
  0x2b   :  { %677 = vmatprep.subr.bf16.mxu0 %v2319_v4  ;;  %v2324_v7 = vld [vmem:[#allocation3 + $0x40] ss:$16 sps:$4 sm:$0xff]   ;;  %v2325_v8 = vld [vmem:[#allocation3 + $0x64] ss:$16 sps:$4 sm:$0xff]   ;;  %v2343_v13 = vld [vmem:[#allocation3 + $0x2c] ss:$16 sps:$4 sm:$0xff]   ;;  %762 = vmatpush1.bf16.msra.mxu1 %v2341_v12 }
  0x2c   :  { %v2327_v10 = vld [vmem:[#allocation3 + $0x60] ss:$16 sps:$4 sm:$0xff]   ;;  %v2328_v11 = vld [vmem:[#allocation3 + $0x84] ss:$16 sps:$4 sm:$0xff]   ;;  %763 = vmatprep.subr.bf16.mxu1 %v2343_v13  ;;  %v2347_v15 = vld [vmem:[#allocation3 + $0x28] ss:$16 sps:$4 sm:$0xff]  }
  0x2d   :  { %v2330_v14 = vld [vmem:[#allocation3 + $0x80] ss:$16 sps:$4 sm:$0xff]   ;;  %v2349_v16 = vld [vmem:[#allocation3 + $0x4c] ss:$16 sps:$4 sm:$0xff]   ;;  %v2331_v17 = vld [vmem:[#allocation3 + $0xa4] ss:$16 sps:$4 sm:$0xff]  }
  0x2e   :  { %678 = vmatpush1.bf16.msra.mxu0 %v2321_v5  ;;  %v2353_v18 = vld [vmem:[#allocation3 + $0x48] ss:$16 sps:$4 sm:$0xff]   ;;  %v2355_v19 = vld [vmem:[#allocation3 + $0x6c] ss:$16 sps:$4 sm:$0xff]   ;;  %v2333_v20 = vld [vmem:[#allocation3 + $0xa0] ss:$16 sps:$4 sm:$0xff]  }
  0x2f   :  { %679 = vmatprep.subr.bf16.mxu0 %v2322_v6  ;;  %764 = vmatpush1.bf16.msra.mxu1 %v2347_v15  ;;  %v2334_v21 = vld [vmem:[#allocation3 + $0xc4] ss:$16 sps:$4 sm:$0xff]   ;;  %v2359_v22 = vld [vmem:[#allocation3 + $0x68] ss:$16 sps:$4 sm:$0xff]   ;;  %v2361_v23 = vld [vmem:[#allocation3 + $0x8c] ss:$16 sps:$4 sm:$0xff]  }
  0x30   :  { %765 = vmatprep.subr.bf16.mxu1 %v2349_v16  ;;  %v2336_v24 = vld [vmem:[#allocation3 + $0xc0] ss:$16 sps:$4 sm:$0xff]   ;;  %v2339_v25 = vld [vmem:[#allocation3 + $0xe4] ss:$16 sps:$4 sm:$0xff]   ;;  %v2365_v26 = vld [vmem:[#allocation3 + $0x88] ss:$16 sps:$4 sm:$0xff]  }
  0x31   :  { %v2367_v27 = vld [vmem:[#allocation3 + $0xac] ss:$16 sps:$4 sm:$0xff]   ;;  %v2342_v28 = vld [vmem:[#allocation3 + $0xe0] ss:$16 sps:$4 sm:$0xff]   ;;  %v2345_v29 = vld [vmem:[#allocation3 + $0x104] ss:$16 sps:$4 sm:$0xff]  }
  0x32   :  { %680 = vmatpush1.bf16.msra.mxu0 %v2324_v7  ;;  %v2371_v30 = vld [vmem:[#allocation3 + $0xa8] ss:$16 sps:$4 sm:$0xff]   ;;  %v2373_v31 = vld [vmem:[#allocation3 + $0xcc] ss:$16 sps:$4 sm:$0xff]   ;;  %v2348_v32 = vld [vmem:[#allocation3 + $0x100] ss:$16 sps:$4 sm:$0xff]  }
  0x33   :  { %681 = vmatprep.subr.bf16.mxu0 %v2325_v8  ;;  %766 = vmatpush1.bf16.msra.mxu1 %v2353_v18  ;;  %v2351_v33 = vld [vmem:[#allocation3 + $0x124] ss:$16 sps:$4 sm:$0xff]   ;;  %v2377_v34 = vld [vmem:[#allocation3 + $0xc8] ss:$16 sps:$4 sm:$0xff]   ;;  %v2379_v35 = vld [vmem:[#allocation3 + $0xec] ss:$16 sps:$4 sm:$0xff]  }
  0x34   :  { %767 = vmatprep.subr.bf16.mxu1 %v2355_v19  ;;  %v2354_v36 = vld [vmem:[#allocation3 + $0x120] ss:$16 sps:$4 sm:$0xff]   ;;  %v2357_v38 = vld [vmem:[#allocation3 + $0x144] ss:$16 sps:$4 sm:$0xff]   ;;  %v2383_v39 = vld [vmem:[#allocation3 + $0xe8] ss:$16 sps:$4 sm:$0xff]  }
  0x35   :  { %v2395_v37 = vld [vmem:[%s2833_s0 + $0x4] ss:$12 sps:$4 sm:$0xff]   ;;  %v2389_v43 = vld [vmem:[#allocation3 + $0x108] ss:$16 sps:$4 sm:$0xff]  }
  0x36   :  { %682 = vmatpush1.bf16.msra.mxu0 %v2327_v10  ;;  %707 = vmatprep.mubr.bf16.mxu0 %v2395_v37  ;;  %v2385_v40 = vld [vmem:[#allocation3 + $0x10c] ss:$16 sps:$4 sm:$0xff]   ;;  %v2360_v41 = vld [vmem:[#allocation3 + $0x140] ss:$16 sps:$4 sm:$0xff]   ;;  %v2363_v42 = vld [vmem:[#allocation3 + $0x164] ss:$16 sps:$4 sm:$0xff]  }
  0x37   :  { %683 = vmatprep.subr.bf16.mxu0 %v2328_v11  ;;  %768 = vmatpush1.bf16.msra.mxu1 %v2359_v22  ;;  %v2391_v44 = vld [vmem:[#allocation3 + $0x12c] ss:$16 sps:$4 sm:$0xff]   ;;  %v2366_v45 = vld [vmem:[#allocation3 + $0x160] ss:$16 sps:$4 sm:$0xff]   ;;  %v2369_v46 = vld [vmem:[#allocation3 + $0x184] ss:$16 sps:$4 sm:$0xff]  }
  0x38   :  { %769 = vmatprep.subr.bf16.mxu1 %v2361_v23  ;;  %793 = vmatprep.mubr.bf16.mxu1 %v2395_v37  ;;  %v2399_v47 = vld [vmem:[#allocation3 + $0x128] ss:$16 sps:$4 sm:$0xff]   ;;  %v2400_v48 = vld [vmem:[#allocation3 + $0x14c] ss:$16 sps:$4 sm:$0xff]   ;;  %v2372_v49 = vld [vmem:[#allocation3 + $0x180] ss:$16 sps:$4 sm:$0xff]  }
  0x39   :  { %v2375_v50 = vld [vmem:[#allocation3 + $0x1a4] ss:$16 sps:$4 sm:$0xff]   ;;  %v2405_v51 = vld [vmem:[#allocation3 + $0x148] ss:$16 sps:$4 sm:$0xff]   ;;  %v2406_v52 = vld [vmem:[#allocation3 + $0x16c] ss:$16 sps:$4 sm:$0xff]  }
  0x3a   :  { %684 = vmatpush1.bf16.msra.mxu0 %v2330_v14  ;;  %v2378_v53 = vld [vmem:[#allocation3 + $0x1a0] ss:$16 sps:$4 sm:$0xff]   ;;  %v2381_v54 = vld [vmem:[#allocation3 + $0x1c4] ss:$16 sps:$4 sm:$0xff]   ;;  %v2411_v55 = vld [vmem:[#allocation3 + $0x168] ss:$16 sps:$4 sm:$0xff]  }
  0x3b   :  { %685 = vmatprep.subr.bf16.mxu0 %v2331_v17  ;;  %770 = vmatpush1.bf16.msra.mxu1 %v2365_v26  ;;  %v2412_v56 = vld [vmem:[#allocation3 + $0x18c] ss:$16 sps:$4 sm:$0xff]   ;;  %v2384_v57 = vld [vmem:[#allocation3 + $0x1c0] ss:$16 sps:$4 sm:$0xff]   ;;  %v2387_v58 = vld [vmem:[#allocation3 + $0x1e4] ss:$16 sps:$4 sm:$0xff]  }
  0x3c   :  { %771 = vmatprep.subr.bf16.mxu1 %v2367_v27  ;;  %v2417_v59 = vld [vmem:[#allocation3 + $0x188] ss:$16 sps:$4 sm:$0xff]   ;;  %v2418_v60 = vld [vmem:[#allocation3 + $0x1ac] ss:$16 sps:$4 sm:$0xff]   ;;  %v2390_v61 = vld [vmem:[#allocation3 + $0x1e0] ss:$16 sps:$4 sm:$0xff]  }
  0x3d   :  { %v2393_v62 = vld [vmem:[%s2833_s0] ss:$12 sps:$4 sm:$0xff]   ;;  %v2398_v63 = vld [vmem:[#allocation3 + $0x204] ss:$16 sps:$4 sm:$0xff]  }
  0x3e   :  { %686 = vmatpush1.bf16.msra.mxu0 %v2333_v20  ;;  %v2423_v0 = vld [vmem:[#allocation3 + $0x1a8] ss:$16 sps:$4 sm:$0xff]   ;;  %v2424_v2 = vld [vmem:[#allocation3 + $0x1cc] ss:$16 sps:$4 sm:$0xff]   ;;  %v2396_v3 = vld [vmem:[#allocation3 + $0x200] ss:$16 sps:$4 sm:$0xff]  }
  0x3f   :  { %687 = vmatprep.subr.bf16.mxu0 %v2334_v21  ;;  %772 = vmatpush1.bf16.msra.mxu1 %v2371_v30  ;;  %v2404_v4 = vld [vmem:[#allocation3 + $0x224] ss:$16 sps:$4 sm:$0xff]   ;;  %v2429_v5 = vld [vmem:[#allocation3 + $0x1c8] ss:$16 sps:$4 sm:$0xff]   ;;  %v2430_v6 = vld [vmem:[#allocation3 + $0x1ec] ss:$16 sps:$4 sm:$0xff]  }
  0x40   :  { %773 = vmatprep.subr.bf16.mxu1 %v2373_v31  ;;  %v2402_v7 = vld [vmem:[#allocation3 + $0x220] ss:$16 sps:$4 sm:$0xff]   ;;  %v2410_v8 = vld [vmem:[#allocation3 + $0x244] ss:$16 sps:$4 sm:$0xff]   ;;  %v2435_v9 = vld [vmem:[#allocation3 + $0x1e8] ss:$16 sps:$4 sm:$0xff]  }
  0x41   :  { %v2438_v10 = vld [vmem:[#allocation3 + $0x20c] ss:$16 sps:$4 sm:$0xff]   ;;  %v2408_v11 = vld [vmem:[#allocation3 + $0x240] ss:$16 sps:$4 sm:$0xff]   ;;  %v2416_v12 = vld [vmem:[#allocation3 + $0x264] ss:$16 sps:$4 sm:$0xff]  }
  0x42   :  { %688 = vmatpush1.bf16.msra.mxu0 %v2336_v24  ;;  %v2436_v13 = vld [vmem:[#allocation3 + $0x208] ss:$16 sps:$4 sm:$0xff]   ;;  %v2444_v14 = vld [vmem:[#allocation3 + $0x22c] ss:$16 sps:$4 sm:$0xff]   ;;  %v2414_v15 = vld [vmem:[#allocation3 + $0x260] ss:$16 sps:$4 sm:$0xff]  }
  0x43   :  { %689 = vmatprep.subr.bf16.mxu0 %v2339_v25  ;;  %774 = vmatpush1.bf16.msra.mxu1 %v2377_v34  ;;  %v2422_v16 = vld [vmem:[#allocation3 + $0x284] ss:$16 sps:$4 sm:$0xff]   ;;  %v2442_v17 = vld [vmem:[#allocation3 + $0x228] ss:$16 sps:$4 sm:$0xff]   ;;  %v2448_v18 = vld [vmem:[#allocation3 + $0x24c] ss:$16 sps:$4 sm:$0xff]  }
  0x44   :  { %775 = vmatprep.subr.bf16.mxu1 %v2379_v35  ;;  %v2420_v19 = vld [vmem:[#allocation3 + $0x280] ss:$16 sps:$4 sm:$0xff]   ;;  %v2428_v20 = vld [vmem:[#allocation3 + $0x2a4] ss:$16 sps:$4 sm:$0xff]   ;;  %v2446_v21 = vld [vmem:[#allocation3 + $0x248] ss:$16 sps:$4 sm:$0xff]  }
  0x45   :  { %v2451_v22 = vld [vmem:[#allocation3 + $0x26c] ss:$16 sps:$4 sm:$0xff]   ;;  %v2426_v23 = vld [vmem:[#allocation3 + $0x2a0] ss:$16 sps:$4 sm:$0xff]   ;;  %v2434_v24 = vld [vmem:[#allocation3 + $0x2c4] ss:$16 sps:$4 sm:$0xff]  }
  0x46   :  { %690 = vmatpush1.bf16.msra.mxu0 %v2342_v28  ;;  %v2449_v25 = vld [vmem:[#allocation3 + $0x268] ss:$16 sps:$4 sm:$0xff]   ;;  %v2454_v26 = vld [vmem:[#allocation3 + $0x28c] ss:$16 sps:$4 sm:$0xff]   ;;  %v2441_v27 = vld [vmem:[#allocation3 + $0x2e4] ss:$16 sps:$4 sm:$0xff]  }
  0x47   :  { %691 = vmatprep.subr.bf16.mxu0 %v2345_v29  ;;  %776 = vmatpush1.bf16.msra.mxu1 %v2383_v39  ;;  %v2452_v28 = vld [vmem:[#allocation3 + $0x288] ss:$16 sps:$4 sm:$0xff]   ;;  %v2457_v29 = vld [vmem:[#allocation3 + $0x2ac] ss:$16 sps:$4 sm:$0xff]   ;;  %v2439_v30 = vld [vmem:[#allocation3 + $0x2e0] ss:$16 sps:$4 sm:$0xff]  }
  0x48   :  { %777 = vmatprep.subr.bf16.mxu1 %v2385_v40  ;;  %v2445_v31 = vld [vmem:[%s2833_s0 + $0x8] ss:$12 sps:$4 sm:$0xff]   ;;  %v2460_v34 = vld [vmem:[#allocation3 + $0x2cc] ss:$16 sps:$4 sm:$0xff]  }
  0x49   :  { %v2464_v35 = vld [vmem:[#allocation5] ss:$16 sps:$4 sm:$0xff]   ;;  %v2458_v37 = vld [vmem:[#allocation3 + $0x2c8] ss:$16 sps:$4 sm:$0xff]   ;;  %v2478_v40 = vld [vmem:[#allocation5 + $0x44] ss:$16 sps:$4 sm:$0xff]  }
  0x4a   :  { %692 = vmatpush1.bf16.msra.mxu0 %v2348_v32  ;;  %v2466_v32 = vld [vmem:[#allocation5 + $0x4] ss:$16 sps:$4 sm:$0xff]   ;;  %v2470_v39 = vld [vmem:[#allocation5 + $0x20] ss:$16 sps:$4 sm:$0xff]  }
  0x4b   :  { %693 = vmatprep.subr.bf16.mxu0 %v2351_v33  ;;  %778 = vmatpush1.bf16.msra.mxu1 %v2389_v43  ;;  %v2455_v33 = vld [vmem:[#allocation3 + $0x2a8] ss:$16 sps:$4 sm:$0xff]  }
  0x4c   :  { %779 = vmatprep.subr.bf16.mxu1 %v2391_v44  ;;  %v2467_v43 = vld [vmem:[#allocation5 + $0x8] ss:$16 sps:$4 sm:$0xff]   ;;  %v2476_v44 = vld [vmem:[#allocation5 + $0x40] ss:$16 sps:$4 sm:$0xff]  }
  0x4e   :  { %694 = vmatpush1.bf16.msra.mxu0 %v2354_v36  ;;  %v2472_v36 = vld [vmem:[#allocation5 + $0x24] ss:$16 sps:$4 sm:$0xff]  }
  0x4f   :  { %695 = vmatprep.subr.bf16.mxu0 %v2357_v38  ;;  %780 = vmatpush1.bf16.msra.mxu1 %v2399_v47  ;;  %v2463_v38 = vld [vmem:[#allocation3 + $0x2ec] ss:$16 sps:$4 sm:$0xff]   ;;  %v2482_v47 = vld [vmem:[#allocation5 + $0x60] ss:$16 sps:$4 sm:$0xff]  }
  0x50   :  { %781 = vmatprep.subr.bf16.mxu1 %v2400_v48  ;;  %v2490_v48 = vld [vmem:[#allocation5 + $0x84] ss:$16 sps:$4 sm:$0xff]  }
  0x52   :  { %696 = vmatpush1.bf16.msra.mxu0 %v2360_v41  ;;  %v2461_v41 = vld [vmem:[#allocation3 + $0x2e8] ss:$16 sps:$4 sm:$0xff]  }
  0x53   :  { %697 = vmatprep.subr.bf16.mxu0 %v2363_v42  ;;  %782 = vmatpush1.bf16.msra.mxu1 %v2405_v51  ;;  %v2469_v42 = vld [vmem:[#allocation5 + $0xc] ss:$16 sps:$4 sm:$0xff]   ;;  %v2488_v51 = vld [vmem:[#allocation5 + $0x80] ss:$16 sps:$4 sm:$0xff]  }
  0x54   :  { %783 = vmatprep.subr.bf16.mxu1 %v2406_v52  ;;  %v2496_v52 = vld [vmem:[#allocation5 + $0xa4] ss:$16 sps:$4 sm:$0xff]  }
  0x56   :  { %698 = vmatpush1.bf16.msra.mxu0 %v2366_v45  ;;  %v2484_v45 = vld [vmem:[#allocation5 + $0x64] ss:$16 sps:$4 sm:$0xff]  }
  0x57   :  { %699 = vmatprep.subr.bf16.mxu0 %v2369_v46  ;;  %784 = vmatpush1.bf16.msra.mxu1 %v2411_v55  ;;  %v2475_v46 = vld [vmem:[#allocation5 + $0x2c] ss:$16 sps:$4 sm:$0xff]   ;;  %v2494_v55 = vld [vmem:[#allocation5 + $0xa0] ss:$16 sps:$4 sm:$0xff]  }
  0x58   :  { %785 = vmatprep.subr.bf16.mxu1 %v2412_v56  ;;  %v2502_v56 = vld [vmem:[#allocation5 + $0xc4] ss:$16 sps:$4 sm:$0xff]  }
  0x5a   :  { %700 = vmatpush1.bf16.msra.mxu0 %v2372_v49  ;;  %v2473_v49 = vld [vmem:[#allocation5 + $0x28] ss:$16 sps:$4 sm:$0xff]  }
  0x5b   :  { %701 = vmatprep.subr.bf16.mxu0 %v2375_v50  ;;  %786 = vmatpush1.bf16.msra.mxu1 %v2417_v59  ;;  %v2481_v50 = vld [vmem:[#allocation5 + $0x4c] ss:$16 sps:$4 sm:$0xff]   ;;  %v2500_v59 = vld [vmem:[#allocation5 + $0xc0] ss:$16 sps:$4 sm:$0xff]  }
  0x5c   :  { %787 = vmatprep.subr.bf16.mxu1 %v2418_v60  ;;  %v2508_v60 = vld [vmem:[#allocation5 + $0xe4] ss:$16 sps:$4 sm:$0xff]  }
  0x5e   :  { %702 = vmatpush1.bf16.msra.mxu0 %v2378_v53  ;;  %v2479_v53 = vld [vmem:[#allocation5 + $0x48] ss:$16 sps:$4 sm:$0xff]  }
  0x5f   :  { %703 = vmatprep.subr.bf16.mxu0 %v2381_v54  ;;  %788 = vmatpush1.bf16.msra.mxu1 %v2423_v0  ;;  %v2487_v54 = vld [vmem:[#allocation5 + $0x6c] ss:$16 sps:$4 sm:$0xff]   ;;  %v2514_v0 = vld [vmem:[#allocation5 + $0x104] ss:$16 sps:$4 sm:$0xff]  }
  0x60   :  { %789 = vmatprep.subr.bf16.mxu1 %v2424_v2  ;;  %v2497_v2 = vld [vmem:[#allocation5 + $0xa8] ss:$16 sps:$4 sm:$0xff]  }
  0x62   :  { %704 = vmatpush1.bf16.msra.mxu0 %v2384_v57  ;;  %v2485_v57 = vld [vmem:[#allocation5 + $0x68] ss:$16 sps:$4 sm:$0xff]  }
  0x63   :  { %705 = vmatprep.subr.bf16.mxu0 %v2387_v58  ;;  %790 = vmatpush1.bf16.msra.mxu1 %v2429_v5  ;;  %v2493_v58 = vld [vmem:[#allocation5 + $0x8c] ss:$16 sps:$4 sm:$0xff]   ;;  %v2520_v5 = vld [vmem:[#allocation5 + $0x124] ss:$16 sps:$4 sm:$0xff]  }
  0x64   :  { %791 = vmatprep.subr.bf16.mxu1 %v2430_v6  ;;  %v2503_v6 = vld [vmem:[#allocation5 + $0xc8] ss:$16 sps:$4 sm:$0xff]  }
  0x66   :  { %706 = vmatpush1.bf16.msra.mxu0 %v2390_v61  ;;  %v2491_v61 = vld [vmem:[#allocation5 + $0x88] ss:$16 sps:$4 sm:$0xff]  }
  0x67   :  { %718 = vmatprep.subr.bf16.mxu0 %v2398_v63  ;;  %792 = vmatpush1.bf16.msra.mxu1 %v2435_v9  ;;  %v2506_v63 = vld [vmem:[#allocation5 + $0xe0] ss:$16 sps:$4 sm:$0xff]   ;;  %v2526_v9 = vld [vmem:[#allocation5 + $0x144] ss:$16 sps:$4 sm:$0xff]  }
  0x68   :  { %804 = vmatprep.subr.bf16.mxu1 %v2438_v10  ;;  %v2509_v10 = vld [vmem:[#allocation5 + $0xe8] ss:$16 sps:$4 sm:$0xff]  }
  0x69   :  { %708 = vmatmul.mubr.bf16.vlgmr.msra.gmra.mrb[0].mxu0 %v2393_v62 }
  0x6a   :  { %719 = vmatpush1.bf16.msra.mxu0 %v2396_v3  ;;  %750 = vmatprep.mubr.bf16.mxu0 %v2708_v1  ;;  %v2505_v3 = vld [vmem:[#allocation5 + $0xcc] ss:$16 sps:$4 sm:$0xff]  }
  0x6b   :  { %720 = vmatprep.subr.bf16.mxu0 %v2404_v4  ;;  %794 = vmatmul.mubr.bf16.vlgmr.msra.gmra.mrb[0].mxu1 %v2393_v62  ;;  %v2499_v62 = vld [vmem:[#allocation5 + $0xac] ss:$16 sps:$4 sm:$0xff]   ;;  %v2512_v4 = vld [vmem:[#allocation5 + $0x100] ss:$16 sps:$4 sm:$0xff]  }
  0x6c   :  { %805 = vmatpush1.bf16.msra.mxu1 %v2436_v13  ;;  %836 = vmatprep.mubr.bf16.mxu1 %v2708_v1  ;;  %v2432_v1 = vld [vmem:[#allocation3 + $0x2c0] ss:$16 sps:$4 sm:$0xff]   ;;  %v2532_v13 = vld [vmem:[#allocation5 + $0x164] ss:$16 sps:$4 sm:$0xff]  }
  0x6d   :  { %806 = vmatprep.subr.bf16.mxu1 %v2444_v14  ;;  %v2515_v14 = vld [vmem:[#allocation5 + $0x108] ss:$16 sps:$4 sm:$0xff]  }
  0x6e   :  { %721 = vmatpush1.bf16.msra.mxu0 %v2402_v7  ;;  %v2511_v7 = vld [vmem:[#allocation5 + $0xec] ss:$16 sps:$4 sm:$0xff]  }
  0x6f   :  { %722 = vmatprep.subr.bf16.mxu0 %v2410_v8  ;;  %v2518_v8 = vld [vmem:[#allocation5 + $0x120] ss:$16 sps:$4 sm:$0xff]  }
  0x70   :  { %807 = vmatpush1.bf16.msra.mxu1 %v2442_v17  ;;  %v2538_v17 = vld [vmem:[#allocation5 + $0x184] ss:$16 sps:$4 sm:$0xff]  }
  0x71   :  { %808 = vmatprep.subr.bf16.mxu1 %v2448_v18  ;;  %v2521_v18 = vld [vmem:[#allocation5 + $0x128] ss:$16 sps:$4 sm:$0xff]  }
  0x72   :  { %723 = vmatpush1.bf16.msra.mxu0 %v2408_v11  ;;  %v2517_v11 = vld [vmem:[#allocation5 + $0x10c] ss:$16 sps:$4 sm:$0xff]  }
  0x73   :  { %724 = vmatprep.subr.bf16.mxu0 %v2416_v12  ;;  %v2524_v12 = vld [vmem:[#allocation5 + $0x140] ss:$16 sps:$4 sm:$0xff]  }
  0x74   :  { %809 = vmatpush1.bf16.msra.mxu1 %v2446_v21  ;;  %v2544_v21 = vld [vmem:[#allocation5 + $0x1a4] ss:$16 sps:$4 sm:$0xff]  }
  0x75   :  { %810 = vmatprep.subr.bf16.mxu1 %v2451_v22  ;;  %v2527_v22 = vld [vmem:[#allocation5 + $0x148] ss:$16 sps:$4 sm:$0xff]  }
  0x76   :  { %725 = vmatpush1.bf16.msra.mxu0 %v2414_v15  ;;  %v2523_v15 = vld [vmem:[#allocation5 + $0x12c] ss:$16 sps:$4 sm:$0xff]  }
  0x77   :  { %726 = vmatprep.subr.bf16.mxu0 %v2422_v16  ;;  %v2530_v16 = vld [vmem:[#allocation5 + $0x160] ss:$16 sps:$4 sm:$0xff]  }
  0x78   :  { %811 = vmatpush1.bf16.msra.mxu1 %v2449_v25  ;;  %v2533_v25 = vld [vmem:[#allocation5 + $0x168] ss:$16 sps:$4 sm:$0xff]  }
  0x79   :  { %812 = vmatprep.subr.bf16.mxu1 %v2454_v26  ;;  %v2541_v26 = vld [vmem:[#allocation5 + $0x18c] ss:$16 sps:$4 sm:$0xff]  }
  0x7a   :  { %727 = vmatpush1.bf16.msra.mxu0 %v2420_v19  ;;  %v2529_v19 = vld [vmem:[#allocation5 + $0x14c] ss:$16 sps:$4 sm:$0xff]  }
  0x7b   :  { %728 = vmatprep.subr.bf16.mxu0 %v2428_v20  ;;  %v2536_v20 = vld [vmem:[#allocation5 + $0x180] ss:$16 sps:$4 sm:$0xff]  }
  0x7c   :  { %813 = vmatpush1.bf16.msra.mxu1 %v2452_v28  ;;  %v2545_v28 = vld [vmem:[#allocation5 + $0x1a8] ss:$16 sps:$4 sm:$0xff]  }
  0x7d   :  { %814 = vmatprep.subr.bf16.mxu1 %v2457_v29  ;;  %v2550_v29 = vld [vmem:[#allocation5 + $0x1c4] ss:$16 sps:$4 sm:$0xff]  }
  0x7e   :  { %729 = vmatpush1.bf16.msra.mxu0 %v2426_v23  ;;  %v2535_v23 = vld [vmem:[#allocation5 + $0x16c] ss:$16 sps:$4 sm:$0xff]  }
  0x7f   :  { %730 = vmatprep.subr.bf16.mxu0 %v2434_v24  ;;  %v2542_v24 = vld [vmem:[#allocation5 + $0x1a0] ss:$16 sps:$4 sm:$0xff]  }
  0x80   :  { %815 = vmatpush1.bf16.msra.mxu1 %v2455_v33  ;;  %v2556_v33 = vld [vmem:[#allocation5 + $0x1e4] ss:$16 sps:$4 sm:$0xff]  }
  0x81   :  { %816 = vmatprep.subr.bf16.mxu1 %v2460_v34  ;;  %v2559_v34 = vld [vmem:[#allocation5 + $0x1ec] ss:$16 sps:$4 sm:$0xff]  }
  0x82   :  { %731 = vmatpush1.bf16.msra.mxu0 %v2432_v1  ;;  %v2539_v1 = vld [vmem:[#allocation5 + $0x188] ss:$16 sps:$4 sm:$0xff]  }
  0x83   :  { %732 = vmatprep.subr.bf16.mxu0 %v2441_v27  ;;  %v2547_v27 = vld [vmem:[#allocation5 + $0x1ac] ss:$16 sps:$4 sm:$0xff]  }
  0x84   :  { %817 = vmatpush1.bf16.msra.mxu1 %v2458_v37  ;;  %v2562_v37 = vld [vmem:[#allocation5 + $0x204] ss:$16 sps:$4 sm:$0xff]  }
  0x85   :  { %818 = vmatprep.subr.bf16.mxu1 %v2463_v38  ;;  %v2565_v38 = vld [vmem:[#allocation5 + $0x20c] ss:$16 sps:$4 sm:$0xff]  }
  0x86   :  { %733 = vmatpush1.bf16.msra.mxu0 %v2439_v30  ;;  %v2553_v30 = vld [vmem:[#allocation5 + $0x1cc] ss:$16 sps:$4 sm:$0xff]  }
  0x87   :  { %1665 = vmatprep.subr.bf16.mxu0 %v2466_v32  ;;  %v2551_v32 = vld [vmem:[#allocation5 + $0x1c8] ss:$16 sps:$4 sm:$0xff]  }
  0x88   :  { %819 = vmatpush1.bf16.msra.mxu1 %v2461_v41 }
  0x89   :  { %751 = vmatmul.mubr.bf16.vlgmr.msra.gmra.mrb[0].mxu0 %v2445_v31  ;;  %1751 = vmatprep.subr.bf16.mxu1 %v2469_v42  ;;  %v157_v42 = vld [vmem:[%s2835_s2] sm:$0xf] }
  0x8a   :  { %1666 = vmatpush1.bf16.msra.mxu0 %v2464_v35  ;;  %v2554_v35 = vld [vmem:[#allocation5 + $0x1e0] ss:$16 sps:$4 sm:$0xff]  }
  0x8b   :  { %1667 = vmatprep.subr.bf16.mxu0 %v2472_v36  ;;  %837 = vmatmul.mubr.bf16.vlgmr.msra.gmra.mrb[0].mxu1 %v2445_v31  ;;  %v2548_v31 = vld [vmem:[#allocation5 + $0x1c0] ss:$16 sps:$4 sm:$0xff]   ;;  %v2557_v36 = vld [vmem:[#allocation5 + $0x1e8] ss:$16 sps:$4 sm:$0xff]  }
  0x8c   :  { %1752 = vmatpush1.bf16.msra.mxu1 %v2467_v43 }
  0x8d   :  { %1753 = vmatprep.subr.bf16.mxu1 %v2475_v46 }
  0x8e   :  { %1668 = vmatpush1.bf16.msra.mxu0 %v2470_v39  ;;  %v159_v39 = vlaneseq }
  0x8f   :  { %1669 = vmatprep.subr.bf16.mxu0 %v2478_v40 }
  0x90   :  { %1754 = vmatpush1.bf16.msra.mxu1 %v2473_v49  ;;  %v160_v40 = vshrl.u32 %v159_v39, 7  ;;  %v2587_v39 = vld [vmem:[#allocation5 + $0x288] ss:$16 sps:$4 sm:$0xff]  }
  0x91   :  { %1755 = vmatprep.subr.bf16.mxu1 %v2481_v50 }
  0x92   :  { %1670 = vmatpush1.bf16.msra.mxu0 %v2476_v44  ;;  %v2788_v41 = vsub.s32 0, %v160_v40  ;;  %v2793_v43 = vsub.s32 1, %v160_v40 }
  0x93   :  { %1671 = vmatprep.subr.bf16.mxu0 %v2484_v45 }
  0x94   :  { %1756 = vmatpush1.bf16.msra.mxu1 %v2479_v53  ;;  %v162_v44 = vrot.slane %v157_v42, %v2788_v41  ;;  %v166_v45 = vrot.slane %v157_v42, %v2793_v43 }
  0x95   :  { %1757 = vmatprep.subr.bf16.mxu1 %v2487_v54  ;;  %v2797_v54 = vsub.s32 2, %v160_v40 }
  0x96   :  { %1672 = vmatpush1.bf16.msra.mxu0 %v2482_v47 }
  0x97   :  { %1673 = vmatprep.subr.bf16.mxu0 %v2490_v48 }
  0x98   :  { %1758 = vmatpush1.bf16.msra.mxu1 %v2485_v57  ;;  %v2799_v57 = vsub.s32 3, %v160_v40  ;;  %v2592_v40 = vld [vmem:[#allocation5 + $0x2a4] ss:$16 sps:$4 sm:$0xff]  }
  0x99   :  { %1759 = vmatprep.subr.bf16.mxu1 %v2493_v58 }
  0x9a   :  { %1674 = vmatpush1.bf16.msra.mxu0 %v2488_v51 }
  0x9b   :  { %1675 = vmatprep.subr.bf16.mxu0 %v2496_v52 }
  0x9c   :  { %1760 = vmatpush1.bf16.msra.mxu1 %v2491_v61 }
  0x9d   :  { %1761 = vmatprep.subr.bf16.mxu1 %v2499_v62  ;;  %v170_v62 = vrot.slane %v157_v42, %v2797_v54 }
  0x9e   :  { %1676 = vmatpush1.bf16.msra.mxu0 %v2494_v55 }
  0x9f   :  { %1677 = vmatprep.subr.bf16.mxu0 %v2502_v56 }
  0xa0   :  { %1762 = vmatpush1.bf16.msra.mxu1 %v2497_v2 }
  0xa1   :  { %1763 = vmatprep.subr.bf16.mxu1 %v2505_v3  ;;  %v174_v3 = vrot.slane %v157_v42, %v2799_v57  ;;  %v2595_v42 = vld [vmem:[#allocation5 + $0x2ac] ss:$16 sps:$4 sm:$0xff]  }
  0xa2   :  { %1678 = vmatpush1.bf16.msra.mxu0 %v2500_v59 }
  0xa3   :  { %1679 = vmatprep.subr.bf16.mxu0 %v2508_v60 }
  0xa4   :  { %1764 = vmatpush1.bf16.msra.mxu1 %v2503_v6  ;;  %v2563_v6 = vld [vmem:[#allocation5 + $0x208] ss:$16 sps:$4 sm:$0xff]  }
  0xa5   :  { %1765 = vmatprep.subr.bf16.mxu1 %v2511_v7  ;;  %v2568_v7 = vld [vmem:[#allocation5 + $0x224] ss:$16 sps:$4 sm:$0xff]  }
  0xa6   :  { %1680 = vmatpush1.bf16.msra.mxu0 %v2506_v63 }
  0xa7   :  { %1681 = vmatprep.subr.bf16.mxu0 %v2514_v0 }
  0xa8   :  { %1766 = vmatpush1.bf16.msra.mxu1 %v2509_v10 }
  0xa9   :  { %1767 = vmatprep.subr.bf16.mxu1 %v2517_v11 }
  0xaa   :  { %1682 = vmatpush1.bf16.msra.mxu0 %v2512_v4 }
  0xab   :  { %1683 = vmatprep.subr.bf16.mxu0 %v2520_v5  ;;  %v2560_v5 = vld [vmem:[#allocation5 + $0x200] ss:$16 sps:$4 sm:$0xff]  }
  0xac   :  { %1768 = vmatpush1.bf16.msra.mxu1 %v2515_v14 }
  0xad   :  { %1769 = vmatprep.subr.bf16.mxu1 %v2523_v15 }
  0xae   :  { %1684 = vmatpush1.bf16.msra.mxu0 %v2518_v8  ;;  %v2571_v8 = vld [vmem:[#allocation5 + $0x22c] ss:$16 sps:$4 sm:$0xff]  }
  0xaf   :  { %1685 = vmatprep.subr.bf16.mxu0 %v2526_v9 }
  0xb0   :  { %1770 = vmatpush1.bf16.msra.mxu1 %v2521_v18 }
  0xb1   :  { %1771 = vmatprep.subr.bf16.mxu1 %v2529_v19 }
  0xb2   :  { %1686 = vmatpush1.bf16.msra.mxu0 %v2524_v12  ;;  %v2566_v12 = vld [vmem:[#allocation5 + $0x220] ss:$16 sps:$4 sm:$0xff]  }
  0xb3   :  { %1687 = vmatprep.subr.bf16.mxu0 %v2532_v13  ;;  %v2569_v13 = vld [vmem:[#allocation5 + $0x228] ss:$16 sps:$4 sm:$0xff]  }
  0xb4   :  { %1772 = vmatpush1.bf16.msra.mxu1 %v2527_v22 }
  0xb5   :  { %1773 = vmatprep.subr.bf16.mxu1 %v2535_v23 }
  0xb6   :  { %1688 = vmatpush1.bf16.msra.mxu0 %v2530_v16  ;;  %v2574_v16 = vld [vmem:[#allocation5 + $0x244] ss:$16 sps:$4 sm:$0xff]  }
  0xb7   :  { %1689 = vmatprep.subr.bf16.mxu0 %v2538_v17 }
  0xb8   :  { %1774 = vmatpush1.bf16.msra.mxu1 %v2533_v25 }
  0xb9   :  { %1775 = vmatprep.subr.bf16.mxu1 %v2541_v26 }
  0xba   :  { %1690 = vmatpush1.bf16.msra.mxu0 %v2536_v20  ;;  %v2577_v20 = vld [vmem:[#allocation5 + $0x24c] ss:$16 sps:$4 sm:$0xff]  }
  0xbb   :  { %1691 = vmatprep.subr.bf16.mxu0 %v2544_v21 }
  0xbc   :  { %1776 = vmatpush1.bf16.msra.mxu1 %v2539_v1  ;;  %v2572_v1 = vld [vmem:[#allocation5 + $0x240] ss:$16 sps:$4 sm:$0xff]  }
  0xbd   :  { %1777 = vmatprep.subr.bf16.mxu1 %v2547_v27  ;;  %v2575_v27 = vld [vmem:[#allocation5 + $0x248] ss:$16 sps:$4 sm:$0xff]  }
  0xbe   :  { %1692 = vmatpush1.bf16.msra.mxu0 %v2542_v24 }
  0xbf   :  { %1693 = vmatprep.subr.bf16.mxu0 %v2550_v29  ;;  %v2580_v29 = vld [vmem:[#allocation5 + $0x264] ss:$16 sps:$4 sm:$0xff]  }
  0xc0   :  { %1778 = vmatpush1.bf16.msra.mxu1 %v2545_v28 }
  0xc1   :  { %1779 = vmatprep.subr.bf16.mxu1 %v2553_v30  ;;  %v2583_v30 = vld [vmem:[#allocation5 + $0x26c] ss:$16 sps:$4 sm:$0xff]  }
  0xc2   :  { %1694 = vmatpush1.bf16.msra.mxu0 %v2548_v31 }
  0xc3   :  { %1695 = vmatprep.subr.bf16.mxu0 %v2556_v33 }
  0xc4   :  { %1780 = vmatpush1.bf16.msra.mxu1 %v2551_v32 }
  0xc5   :  { %1781 = vmatprep.subr.bf16.mxu1 %v2559_v34  ;;  %v2578_v34 = vld [vmem:[#allocation5 + $0x260] ss:$16 sps:$4 sm:$0xff]  }
  0xc6   :  { %1696 = vmatpush1.bf16.msra.mxu0 %v2554_v35  ;;  %v2581_v35 = vld [vmem:[#allocation5 + $0x268] ss:$16 sps:$4 sm:$0xff]  }
  0xc7   :  { %1708 = vmatprep.subr.bf16.mxu0 %v2562_v37  ;;  %v2589_v37 = vld [vmem:[#allocation5 + $0x28c] ss:$16 sps:$4 sm:$0xff]  }
  0xc8   :  { %1782 = vmatpush1.bf16.msra.mxu1 %v2557_v36  ;;  %v2586_v36 = vld [vmem:[#allocation5 + $0x284] ss:$16 sps:$4 sm:$0xff]  }
  0xc9   :  { %1794 = vmatprep.subr.bf16.mxu1 %v2565_v38  ;;  %v2584_v38 = vld [vmem:[#allocation5 + $0x280] ss:$16 sps:$4 sm:$0xff]  }
 0x15c   :  { %v752_v46 = vpop.f32.mrb[0].mxu0 }
 0x15d   :  { %v2276_v47 = vadd.f32 %v752_v46, %v162_v44  ;;  %v754_v48 = vpop.f32.mrb[1].mxu0  ;;  %v2598_v46 = vld [vmem:[#allocation5 + $0x2c4] ss:$16 sps:$4 sm:$0xff]  }
 0x15e   :  { %v2277_v49 = vadd.f32 %v754_v48, %v166_v45  ;;  %v756_v50 = vpop.f32.mrb[2].mxu0  ;;  %v838_v9 = vpop.f32.mrb[0].mxu1  ;;  %v2596_v48 = vld [vmem:[#allocation5 + $0x2c0] ss:$16 sps:$4 sm:$0xff]  }
 0x15f   :  { %v855_v51 = vmul.f32 0.2, %v2276_v47  ;;  %v2278_v52 = vadd.f32 %v756_v50, %v162_v44  ;;  %v758_v53 = vpop.f32.mrb[3].mxu0  ;;  %vm847_vm0 = vcmp.gt.f32.partialorder %v2276_v47, 0.0  ;;  %v2280_v10 = vadd.f32 %v838_v9, %v170_v62  ;;  %v840_v11 = vpop.f32.mrb[1].mxu1 }
 0x160   :  { %v856_v55 = vmul.f32 0.2, %v2277_v49  ;;  %v2279_v56 = vadd.f32 %v758_v53, %v166_v45  ;;  %vm848_vm1 = vcmp.gt.f32.partialorder %v2277_v49, 0.0  ;;  %v2281_v14 = vadd.f32 %v840_v11, %v174_v3  ;;  %v842_v15 = vpop.f32.mrb[2].mxu1  ;;  %v2590_v44 = vld [vmem:[#allocation5 + $0x2a0] ss:$16 sps:$4 sm:$0xff]  }
 0x161   :  { %vm851_vm2 = vcmp.gt.f32.partialorder %v2278_v52, 0.0  ;;  %v859_v58 = vmul.f32 0.2, %v2278_v52  ;;  %v863_v60 = vsel %vm847_vm0, %v2276_v47, %v855_v51  ;;  %vm849_vm4 = vcmp.gt.f32.partialorder %v2280_v10, 0.0  ;;  %v844_v19 = vpop.f32.mrb[3].mxu1 }
 0x162   :  { %vm852_vm3 = vcmp.gt.f32.partialorder %v2279_v56, 0.0  ;;  %v860_v59 = vmul.f32 0.2, %v2279_v56  ;;  %v864_v0 = vsel %vm848_vm1, %v2277_v49, %v856_v55  ;;  %v857_v17 = vmul.f32 0.2, %v2280_v10 }
 0x163   :  { %v867_v61 = vsel %vm851_vm2, %v2278_v52, %v859_v58  ;;  %v2282_v18 = vadd.f32 %v842_v15, %v170_v62  ;;  %vm850_vm5 = vcmp.gt.f32.partialorder %v2281_v14, 0.0  ;;  %v858_v21 = vmul.f32 0.2, %v2281_v14  ;;  %v2593_v45 = vld [vmem:[#allocation5 + $0x2a8] ss:$16 sps:$4 sm:$0xff]  }
 0x164   :  { %v871_v63 = vpack.c.bf16 %v867_v61, %v863_v60  ;;  %v868_v2 = vsel %vm852_vm3, %v2279_v56, %v860_v59  ;;  %v2283_v22 = vadd.f32 %v844_v19, %v174_v3  ;;  %v865_v23 = vsel %vm849_vm4, %v2280_v10, %v857_v17  ;;  %v2601_v47 = vld [vmem:[#allocation5 + $0x2cc] ss:$16 sps:$4 sm:$0xff]   ;;  %v2599_v49 = vld [vmem:[#allocation5 + $0x2c8] ss:$16 sps:$4 sm:$0xff]   ;;  %v2604_v50 = vld [vmem:[#allocation5 + $0x2e4] ss:$16 sps:$4 sm:$0xff]  }
 0x165   :  { %v872_v4 = vpack.c.bf16 %v868_v2, %v864_v0  ;;  %vm853_vm6 = vcmp.gt.f32.partialorder %v2282_v18, 0.0  ;;  %v861_v24 = vmul.f32 0.2, %v2282_v18  ;;  %v866_v26 = vsel %vm850_vm5, %v2281_v14, %v858_v21  ;;  %v2607_v51 = vld [vmem:[#allocation5 + $0x2ec] ss:$16 sps:$4 sm:$0xff]  }
 0x166   :  { %vm854_vm7 = vcmp.gt.f32.partialorder %v2283_v22, 0.0  ;;  %v862_v25 = vmul.f32 0.2, %v2283_v22  ;;  %v2602_v52 = vld [vmem:[#allocation5 + $0x2e0] ss:$16 sps:$4 sm:$0xff]   ;;  %vm2033_vm0 = vcmask 122880  }
 0x167   :  { %1697 = vmatprep.mubr.bf16.mxu0 %v872_v4  ;;  %1783 = vmatprep.mubr.bf16.mxu1 %v872_v4  ;;  %v869_v28 = vsel %vm853_vm6, %v2282_v18, %v861_v24  ;;  %v2605_v53 = vld [vmem:[#allocation5 + $0x2e8] ss:$16 sps:$4 sm:$0xff]   ;;  %v2610_v55 = vld [vmem:[#allocation5 + $0x304] ss:$16 sps:$4 sm:$0xff]   ;;  %v2613_v56 = vld [vmem:[#allocation5 + $0x30c] ss:$16 sps:$4 sm:$0xff]  }
 0x168   :  { %1698 = vmatmul.mubr.bf16.vlgmr.msra.gmra.mrb[4].mxu0 %v871_v63  ;;  %1784 = vmatmul.mubr.bf16.vlgmr.msra.gmra.mrb[4].mxu1 %v871_v63  ;;  %v2803_v31 = vpack.c.bf16 %v869_v28, %v865_v23  ;;  %v870_v32 = vsel %vm854_vm7, %v2283_v22, %v862_v25  ;;  %v2608_v58 = vld [vmem:[#allocation5 + $0x300] ss:$16 sps:$4 sm:$0xff]   ;;  %v2611_v59 = vld [vmem:[#allocation5 + $0x308] ss:$16 sps:$4 sm:$0xff]   ;;  %v2616_v60 = vld [vmem:[#allocation5 + $0x324] ss:$16 sps:$4 sm:$0xff]  }
 0x169   :  { %1709 = vmatpush1.bf16.msra.mxu0 %v2560_v5  ;;  %1795 = vmatpush1.bf16.msra.mxu1 %v2563_v6  ;;  %v874_v33 = vpack.c.bf16 %v870_v32, %v866_v26  ;;  %v2619_v61 = vld [vmem:[#allocation5 + $0x32c] ss:$16 sps:$4 sm:$0xff]   ;;  %v2614_v62 = vld [vmem:[#allocation5 + $0x320] ss:$16 sps:$4 sm:$0xff]   ;;  %v2617_v63 = vld [vmem:[#allocation5 + $0x328] ss:$16 sps:$4 sm:$0xff]  }
 0x16a   :  { %1710 = vmatprep.subr.bf16.mxu0 %v2568_v7  ;;  %1796 = vmatprep.subr.bf16.mxu1 %v2571_v8  ;;  %v2622_v0 = vld [vmem:[#allocation5 + $0x344] ss:$16 sps:$4 sm:$0xff]   ;;  %v2625_v2 = vld [vmem:[#allocation5 + $0x34c] ss:$16 sps:$4 sm:$0xff]   ;;  %v2620_v3 = vld [vmem:[#allocation5 + $0x340] ss:$16 sps:$4 sm:$0xff]  }
 0x16b   :  { %1740 = vmatprep.mubr.bf16.mxu0 %v874_v33  ;;  %1826 = vmatprep.mubr.bf16.mxu1 %v874_v33  ;;  %v2623_v4 = vld [vmem:[#allocation5 + $0x348] ss:$16 sps:$4 sm:$0xff]   ;;  %v2628_v5 = vld [vmem:[#allocation5 + $0x364] ss:$16 sps:$4 sm:$0xff]   ;;  %v2631_v6 = vld [vmem:[#allocation5 + $0x36c] ss:$16 sps:$4 sm:$0xff]  }
 0x16c   :  { %v2626_v7 = vld [vmem:[#allocation5 + $0x360] ss:$16 sps:$4 sm:$0xff]   ;;  %v2629_v8 = vld [vmem:[#allocation5 + $0x368] ss:$16 sps:$4 sm:$0xff]   ;;  %v2634_v9 = vld [vmem:[#allocation5 + $0x384] ss:$16 sps:$4 sm:$0xff]  }
 0x16d   :  { %1711 = vmatpush1.bf16.msra.mxu0 %v2566_v12  ;;  %1797 = vmatpush1.bf16.msra.mxu1 %v2569_v13  ;;  %v2637_v10 = vld [vmem:[#allocation5 + $0x38c] ss:$16 sps:$4 sm:$0xff]   ;;  %v2632_v11 = vld [vmem:[#allocation5 + $0x380] ss:$16 sps:$4 sm:$0xff]   ;;  %v2635_v12 = vld [vmem:[#allocation5 + $0x388] ss:$16 sps:$4 sm:$0xff]  }
 0x16e   :  { %1712 = vmatprep.subr.bf16.mxu0 %v2574_v16  ;;  %1798 = vmatprep.subr.bf16.mxu1 %v2577_v20  ;;  %v2640_v13 = vld [vmem:[#allocation5 + $0x3a4] ss:$16 sps:$4 sm:$0xff]   ;;  %v2643_v14 = vld [vmem:[#allocation5 + $0x3ac] ss:$16 sps:$4 sm:$0xff]   ;;  %v2638_v15 = vld [vmem:[#allocation5 + $0x3a0] ss:$16 sps:$4 sm:$0xff]  }
 0x16f   :  { %v2641_v16 = vld [vmem:[#allocation5 + $0x3a8] ss:$16 sps:$4 sm:$0xff]   ;;  %v2646_v17 = vld [vmem:[#allocation5 + $0x3c4] ss:$16 sps:$4 sm:$0xff]   ;;  %v2649_v18 = vld [vmem:[#allocation5 + $0x3cc] ss:$16 sps:$4 sm:$0xff]  }
 0x170   :  { %v2644_v19 = vld [vmem:[#allocation5 + $0x3c0] ss:$16 sps:$4 sm:$0xff]   ;;  %v2647_v20 = vld [vmem:[#allocation5 + $0x3c8] ss:$16 sps:$4 sm:$0xff]   ;;  %v2652_v21 = vld [vmem:[#allocation5 + $0x3e4] ss:$16 sps:$4 sm:$0xff]  }
 0x171   :  { %1713 = vmatpush1.bf16.msra.mxu0 %v2572_v1  ;;  %1799 = vmatpush1.bf16.msra.mxu1 %v2575_v27  ;;  %v2655_v22 = vld [vmem:[#allocation5 + $0x3ec] ss:$16 sps:$4 sm:$0xff]   ;;  %v2650_v23 = vld [vmem:[#allocation5 + $0x3e0] ss:$16 sps:$4 sm:$0xff]   ;;  %v2653_v24 = vld [vmem:[#allocation5 + $0x3e8] ss:$16 sps:$4 sm:$0xff]  }
 0x172   :  { %1714 = vmatprep.subr.bf16.mxu0 %v2580_v29  ;;  %1800 = vmatprep.subr.bf16.mxu1 %v2583_v30  ;;  %v2810_v25 = vld [vmem:[%s2838_s5] sm:$0xf] }
 0x173   :  { %v1880_v26 = vrot.slane %v2810_v25, %v2793_v43  ;;  %v1888_v1 = vrot.slane %v2810_v25, %v2799_v57  ;;  %v1862_v27 = vld [vmem:[#allocation2] sm:$0x1] }
 0x174   :  { %1865 = vperm.xlu0 %2315, %v1862_v27   ;;  %v1003_v28 = vld [vmem:[%s2837_s4] sm:$0xf] }
 0x175   :  { %1715 = vmatpush1.bf16.msra.mxu0 %v2578_v34  ;;  %1801 = vmatpush1.bf16.msra.mxu1 %v2581_v35  ;;  %v1008_v29 = vrot.slane %v1003_v28, %v2788_v41  ;;  %v1016_v30 = vrot.slane %v1003_v28, %v2797_v54  ;;  %v1020_v32 = vrot.slane %v1003_v28, %v2799_v57 }
 0x176   :  { %1716 = vmatprep.subr.bf16.mxu0 %v2586_v36  ;;  %1802 = vmatprep.subr.bf16.mxu1 %v2589_v37 }
 0x179   :  { %1717 = vmatpush1.bf16.msra.mxu0 %v2584_v38  ;;  %1803 = vmatpush1.bf16.msra.mxu1 %v2587_v39 }
 0x17a   :  { %1718 = vmatprep.subr.bf16.mxu0 %v2592_v40  ;;  %1804 = vmatprep.subr.bf16.mxu1 %v2595_v42 }
 0x17d   :  { %1719 = vmatpush1.bf16.msra.mxu0 %v2590_v44  ;;  %1805 = vmatpush1.bf16.msra.mxu1 %v2593_v45 }
 0x17e   :  { %1720 = vmatprep.subr.bf16.mxu0 %v2598_v46  ;;  %1806 = vmatprep.subr.bf16.mxu1 %v2601_v47 }
 0x181   :  { %1721 = vmatpush1.bf16.msra.mxu0 %v2596_v48  ;;  %1807 = vmatpush1.bf16.msra.mxu1 %v2599_v49 }
 0x182   :  { %1722 = vmatprep.subr.bf16.mxu0 %v2604_v50  ;;  %1808 = vmatprep.subr.bf16.mxu1 %v2607_v51 }
 0x185   :  { %1723 = vmatpush1.bf16.msra.mxu0 %v2602_v52  ;;  %1809 = vmatpush1.bf16.msra.mxu1 %v2605_v53 }
 0x186   :  { %1724 = vmatprep.subr.bf16.mxu0 %v2610_v55  ;;  %1810 = vmatprep.subr.bf16.mxu1 %v2613_v56 }
 0x189   :  { %1725 = vmatpush1.bf16.msra.mxu0 %v2608_v58  ;;  %1811 = vmatpush1.bf16.msra.mxu1 %v2611_v59 }
 0x18a   :  { %1726 = vmatprep.subr.bf16.mxu0 %v2616_v60  ;;  %1812 = vmatprep.subr.bf16.mxu1 %v2619_v61 }
 0x18d   :  { %1727 = vmatpush1.bf16.msra.mxu0 %v2614_v62  ;;  %1813 = vmatpush1.bf16.msra.mxu1 %v2617_v63 }
 0x18e   :  { %1728 = vmatprep.subr.bf16.mxu0 %v2622_v0  ;;  %1814 = vmatprep.subr.bf16.mxu1 %v2625_v2 }
 0x191   :  { %1729 = vmatpush1.bf16.msra.mxu0 %v2620_v3  ;;  %1815 = vmatpush1.bf16.msra.mxu1 %v2623_v4 }
 0x192   :  { %1730 = vmatprep.subr.bf16.mxu0 %v2628_v5  ;;  %1816 = vmatprep.subr.bf16.mxu1 %v2631_v6 }
 0x195   :  { %1731 = vmatpush1.bf16.msra.mxu0 %v2626_v7  ;;  %1817 = vmatpush1.bf16.msra.mxu1 %v2629_v8  ;;  %v1876_v8 = vrot.slane %v2810_v25, %v2788_v41 }
 0x196   :  { %1732 = vmatprep.subr.bf16.mxu0 %v2634_v9  ;;  %1818 = vmatprep.subr.bf16.mxu1 %v2637_v10  ;;  %v1884_v9 = vrot.slane %v2810_v25, %v2797_v54 }
 0x199   :  { %1733 = vmatpush1.bf16.msra.mxu0 %v2632_v11  ;;  %1819 = vmatpush1.bf16.msra.mxu1 %v2635_v12 }
 0x19a   :  { %1734 = vmatprep.subr.bf16.mxu0 %v2640_v13  ;;  %1820 = vmatprep.subr.bf16.mxu1 %v2643_v14 }
 0x19d   :  { %1735 = vmatpush1.bf16.msra.mxu0 %v2638_v15  ;;  %1821 = vmatpush1.bf16.msra.mxu1 %v2641_v16 }
 0x19e   :  { %1736 = vmatprep.subr.bf16.mxu0 %v2646_v17  ;;  %1822 = vmatprep.subr.bf16.mxu1 %v2649_v18 }
 0x1a1   :  { %1737 = vmatpush1.bf16.msra.mxu0 %v2644_v19  ;;  %1823 = vmatpush1.bf16.msra.mxu1 %v2647_v20 }
 0x1a2   :  { %1738 = vmatprep.subr.bf16.mxu0 %v2652_v21  ;;  %1824 = vmatprep.subr.bf16.mxu1 %v2655_v22 }
 0x1a5   :  { %1739 = vmatpush1.bf16.msra.mxu0 %v2650_v23  ;;  %1825 = vmatpush1.bf16.msra.mxu1 %v2653_v24 }
 0x1a8   :  { %1741 = vmatmul.mubr.bf16.vlgmr.msra.gmra.mrb[4].mxu0 %v2803_v31  ;;  %1827 = vmatmul.mubr.bf16.vlgmr.msra.gmra.mrb[4].mxu1 %v2803_v31  ;;  %v1012_v31 = vrot.slane %v1003_v28, %v2793_v43 }
 0x1a9   :  { %1957 = vmatprep.mubr.f32.mxu1 %v1880_v26  ;;  %2027 = vmatprep.mubr.f32.mxu0 %v1888_v1 }
 0x1f3   :  { %v1866_v10 = vpop.permute.xlu0 %1865 }
 0x1f4   :  { %v1871_v11 = vrot.slane %v1866_v10, %v2788_v41 }
 0x27b   :  { %v1742_v33 = vpop.f32.mrb[4].mxu0  ;;  %v1828_v34 = vpop.f32.mrb[4].mxu1 }
 0x27c   :  { %v2284_v35 = vadd.f32 %v1742_v33, %v1008_v29  ;;  %v2288_v36 = vadd.f32 %v1828_v34, %v1016_v30  ;;  %v1744_v37 = vpop.f32.mrb[5].mxu0  ;;  %v1830_v38 = vpop.f32.mrb[5].mxu1 }
 0x27d   :  { %v2285_v39 = vadd.f32 %v1744_v37, %v1012_v31  ;;  %v2289_v40 = vadd.f32 %v1830_v38, %v1020_v32  ;;  %v1746_v42 = vpop.f32.mrb[6].mxu0  ;;  %v1832_v44 = vpop.f32.mrb[6].mxu1 }
 0x27e   :  { %vm1837_vm8 = vcmp.gt.f32.partialorder %v2284_v35, 0.0  ;;  %v1845_v45 = vmul.f32 0.2, %v2284_v35  ;;  %vm1839_vm9 = vcmp.gt.f32.partialorder %v2288_v36, 0.0  ;;  %v1847_v46 = vmul.f32 0.2, %v2288_v36 }
 0x27f   :  { %vm1838_vm10 = vcmp.gt.f32.partialorder %v2285_v39, 0.0  ;;  %v1846_v47 = vmul.f32 0.2, %v2285_v39  ;;  %vm1840_vm11 = vcmp.gt.f32.partialorder %v2289_v40, 0.0  ;;  %v1848_v43 = vmul.f32 0.2, %v2289_v40 }
 0x280   :  { %v2286_v48 = vadd.f32 %v1746_v42, %v1008_v29  ;;  %v2290_v57 = vadd.f32 %v1832_v44, %v1016_v30  ;;  %v1748_v49 = vpop.f32.mrb[7].mxu0  ;;  %v1834_v50 = vpop.f32.mrb[7].mxu1  ;;  %v1853_v51 = vsel %vm1837_vm8, %v2284_v35, %v1845_v45  ;;  %v1855_v52 = vsel %vm1839_vm9, %v2288_v36, %v1847_v46 }
 0x281   :  { %v2287_v53 = vadd.f32 %v1748_v49, %v1012_v31  ;;  %v2291_v55 = vadd.f32 %v1834_v50, %v1020_v32  ;;  %v1854_v63 = vsel %vm1838_vm10, %v2285_v39, %v1846_v47  ;;  %v1856_v0 = vsel %vm1840_vm11, %v2289_v40, %v1848_v43 }
 0x282   :  { %vm1841_vm12 = vcmp.gt.f32.partialorder %v2286_v48, 0.0  ;;  %v1849_v56 = vmul.f32 0.2, %v2286_v48  ;;  %vm1843_vm13 = vcmp.gt.f32.partialorder %v2290_v57, 0.0  ;;  %v1851_v58 = vmul.f32 0.2, %v2290_v57 }
 0x283   :  { %vm1842_vm14 = vcmp.gt.f32.partialorder %v2287_v53, 0.0  ;;  %v1850_v59 = vmul.f32 0.2, %v2287_v53  ;;  %vm1844_vm15 = vcmp.gt.f32.partialorder %v2291_v55, 0.0  ;;  %v1852_v60 = vmul.f32 0.2, %v2291_v55 }
 0x284   :  { %v1857_v61 = vsel %vm1841_vm12, %v2286_v48, %v1849_v56  ;;  %v1859_v62 = vsel %vm1843_vm13, %v2290_v57, %v1851_v58 }
 0x285   :  { %v2270_v2 = vpack.c.bf16 %v1857_v61, %v1853_v51  ;;  %v2274_v3 = vpack.c.bf16 %v1859_v62, %v1855_v52  ;;  %v1858_v4 = vsel %vm1842_vm14, %v2287_v53, %v1850_v59  ;;  %v1860_v5 = vsel %vm1844_vm15, %v2291_v55, %v1852_v60 }
 0x286   :  { %v2268_v6 = vpack.c.bf16 %v1858_v4, %v1854_v63  ;;  %v2272_v7 = vpack.c.bf16 %v1860_v5, %v1856_v0 }
 0x288   :  { %2269 = vmatprep.subr.bf16.mxu1 %v2268_v6  ;;  %2273 = vmatprep.subr.bf16.mxu0 %v2272_v7 }
 0x289   :  { %2271 = vmatpush1.bf16.xpose.msra.mxu1 %v2270_v2  ;;  %2275 = vmatpush1.bf16.xpose.msra.mxu0 %v2274_v3 }
 0x290   :  { %1958 = vmatmul.mubr.f32.vlgmr.msra.gmra.mrb[8].mxu1 %v1876_v8  ;;  %2028 = vmatmul.mubr.f32.vlgmr.msra.gmra.mrb[8].mxu0 %v1884_v9 }
 0x363   :  { %v1959_v12 = vpop.f32.mrb[8].mxu1  ;;  %v2029_v13 = vpop.f32.mrb[8].mxu0 }
 0x364   :  { %v1960_v14 = vadd.f32 %v1959_v12, %v1871_v11  ;;  %v1961_v15 = vpop.f32.mrb[9].mxu1  ;;  %v2031_v16 = vpop.f32.mrb[9].mxu0 }
 0x366   :  { %v2030_v17 = vadd.f32 %v2029_v13, %v1960_v14 }
 0x368   :  { %2034 = vst.msk [vmem:[%s2840_s7] sm:$0x1] %vm2033_vm0, %v2030_v17 }
 0x369   :  { %2039 = vsyncpa [#allocation4], 1 }
 0x36a   :  { %2040 = vsyncpa [#allocation6], 1 }

</bundles_post_ra>
